<compile_context>
chip_gen: v5e
topology: v5e:2x2
jax: 0.10.0
libtpu: 0.0.40
codegen_flags: <defaults>
</compile_context>

<pallas_src>
import jax
import jax.numpy as jnp
from jax.experimental import pallas as pl
from jax.experimental.pallas import tpu as pltpu

IN_DIM = 28 * 28     # 784
HID = 150
OUT = 10
OUT_PAD = 128        # lane-dense width used for the in-kernel fc2 / softmax math
TB_MAX = 2048        # max batch-tile rows
NEG_BIG = -1e30      # bias for padded logit lanes (never wins max, exp()==0)


def _round_up(n, m):
    return (n + m - 1) // m * m


def netfull_kernel(x_ref, w1_ref, b1_ref, w2_ref, b2_ref, o_ref):
    # x arrives as f32 straight from HBM; cast to bf16 in VMEM (VPU) so the
    # wrapper never does a separate HBM cast pass.
    x_bf = x_ref[...].astype(jnp.bfloat16)

    # fc1: bf16 MXU matmul with f32 accumulate, bias add + tanh in f32 (EUP).
    h = jnp.tanh(
        jnp.dot(x_bf, w1_ref[...], preferred_element_type=jnp.float32)
        + b1_ref[...]
    )

    # fc2 on the lane-padded (150,128) weight; padded lanes get bias -1e30.
    logits = (
        jnp.dot(h.astype(w2_ref.dtype), w2_ref[...],
                preferred_element_type=jnp.float32)
        + b2_ref[...]
    )

    # Numerically-stable log_softmax over the feature axis; padded lanes
    # (logit == -1e30) never win the max and contribute exactly 0 to the sum,
    # so the result over the first 10 lanes equals log_softmax over 10 lanes.
    m = jnp.max(logits, axis=1, keepdims=True)
    shifted = logits - m
    lse = jnp.log(jnp.sum(jnp.exp(shifted), axis=1, keepdims=True))

    # Store only the 10 real columns (masked vst; output HBM block is (TB,10)).
    o_ref[...] = (shifted - lse)[:, :OUT].astype(o_ref.dtype)


def netfull_forward(x_nchw, w1, b1, w2, b2):
    """x_nchw: (B,1,28,28) f32.  w1:(784,150), b1:(150,), w2:(150,10), b2:(10,)."""
    B = x_nchw.shape[0]
    x = x_nchw.reshape(B, IN_DIM)                       # nn.Flatten (layout no-op)

    # Balanced batch tiling:
    #  - at least 2 tiles (so v7x megacore gets both TensorCores busy),
    #  - TB a multiple of 16 (bf16 sublane packing),
    #  - padding waste < 16 rows per tile instead of up to a whole tile.
    n_tiles = max(2, pl.cdiv(B, TB_MAX))
    TB = min(TB_MAX, _round_up(pl.cdiv(B, n_tiles), 16))
    B_pad = n_tiles * TB
    if B_pad != B:
        x = jnp.pad(x, ((0, B_pad - B), (0, 0)))

    # Weights in bf16 (f32 accumulate inside the kernel); x stays f32 in HBM.
    w1_bf = w1.astype(jnp.bfloat16)

    # Lane-dense fc2: zero-pad weight columns, padded biases = -1e30 (keep f32).
    w2_pad = jnp.zeros((HID, OUT_PAD), jnp.float32).at[:, :OUT].set(w2)
    w2_bf = w2_pad.astype(jnp.bfloat16)
    b2_pad = jnp.full((1, OUT_PAD), NEG_BIG, jnp.float32).at[0, :OUT].set(b2)
    b1_2d = b1.reshape(1, HID).astype(jnp.float32)

    grid = (n_tiles,)
    cost = pl.CostEstimate(
        flops=int(2 * B_pad * (IN_DIM * HID + HID * OUT_PAD)),
        transcendentals=int(B_pad * (HID + OUT_PAD)),
        bytes_accessed=int(
            B_pad * IN_DIM * 4                       # x (f32, read once)
            + w1_bf.size * 2 + w2_bf.size * 2        # resident bf16 weights
            + b1_2d.size * 4 + b2_pad.size * 4
            + B_pad * OUT * 4                        # output (only 10 cols)
        ),
    )

    out = pl.pallas_call(
        netfull_kernel,
        out_shape=jax.ShapeDtypeStruct((B_pad, OUT), jnp.float32),
        grid=grid,
        in_specs=[
            pl.BlockSpec((TB, IN_DIM), lambda i: (i, 0)),    # x: f32, tiled over batch
            pl.BlockSpec((IN_DIM, HID), lambda i: (0, 0)),   # w1: VMEM-resident
            pl.BlockSpec((1, HID), lambda i: (0, 0)),        # b1
            pl.BlockSpec((HID, OUT_PAD), lambda i: (0, 0)),  # w2 (lane-padded)
            pl.BlockSpec((1, OUT_PAD), lambda i: (0, 0)),    # b2 (lane-padded, f32)
        ],
        out_specs=pl.BlockSpec((TB, OUT), lambda i: (i, 0)), # only real 10 cols hit HBM
        compiler_params=pltpu.CompilerParams(
            dimension_semantics=("parallel",),      # megacore sharding on v7x
            vmem_limit_bytes=48 * 1024 * 1024,      # f32 x tiles at TB=2048 (~26 MiB)
        ),
        cost_estimate=cost,
    )(x, w1_bf, b1_2d, w2_bf, b2_pad)

    return out[:B]


def init_params(key):
    """Deterministic init mirroring PyTorch nn.Linear default (U[-1/sqrt(fan_in), +])."""
    k1, k2, k3, k4 = jax.random.split(key, 4)
    lim1 = 1.0 / jnp.sqrt(jnp.float32(IN_DIM))
    lim2 = 1.0 / jnp.sqrt(jnp.float32(HID))
    # stored already transposed: (in, out)
    w1 = jax.random.uniform(k1, (IN_DIM, HID), jnp.float32, -lim1, lim1)
    b1 = jax.random.uniform(k2, (HID,), jnp.float32, -lim1, lim1)
    w2 = jax.random.uniform(k3, (HID, OUT), jnp.float32, -lim2, lim2)
    b2 = jax.random.uniform(k4, (OUT,), jnp.float32, -lim2, lim2)
    return w1, b1, w2, b2


if __name__ == "__main__":
    key = jax.random.PRNGKey(0)
    kx, kp = jax.random.split(key)

    B = 8
    x = jax.random.normal(kx, (B, 1, 28, 28), jnp.float32)  # NCHW like PyTorch
    w1, b1, w2, b2 = init_params(kp)

    out = netfull_forward(x, w1, b1, w2, b2)
    out = jax.block_until_ready(out)
    assert out.shape == (B, OUT)

    # Self-check 1: same-precision (bf16 matmuls, f32 accumulate) reference.
    xf = x.reshape(B, IN_DIM)
    h_bf = jnp.tanh(
        jnp.dot(xf.astype(jnp.bfloat16), w1.astype(jnp.bfloat16),
                preferred_element_type=jnp.float32) + b1
    )
    logits_bf = jnp.dot(h_bf.astype(jnp.bfloat16), w2.astype(jnp.bfloat16),
                        preferred_element_type=jnp.float32) + b2
    ref_bf = jax.nn.log_softmax(logits_bf, axis=1)
    assert jnp.allclose(out, ref_bf, atol=1e-3, rtol=1e-3)

    # Self-check 2: loose check against the pure-f32 PyTorch-equivalent math.
    h_f32 = jnp.tanh(xf @ w1 + b1)
    ref_f32 = jax.nn.log_softmax(h_f32 @ w2 + b2, axis=1)
    assert jnp.allclose(out, ref_f32, atol=5e-2, rtol=5e-2)

    print("KERNEL_OK")
</pallas_src>

<mosaic_0001>
module attributes {stable_mosaic.version = 11 : i64} {
  func.func @netfull_kernel(%arg0: i32, %arg1: memref<16x784xf32, #tpu.memory_space<vmem>>, %arg2: memref<784x150xbf16, #tpu.memory_space<vmem>>, %arg3: memref<1x150xf32, #tpu.memory_space<vmem>>, %arg4: memref<150x128xbf16, #tpu.memory_space<vmem>>, %arg5: memref<1x128xf32, #tpu.memory_space<vmem>>, %arg6: memref<16x10xf32, #tpu.memory_space<vmem>>) attributes {dimension_semantics = [#tpu.dimension_semantics<parallel>], iteration_bounds = array<i64: 2>, scalar_prefetch = 0 : i64, scratch_operands = 0 : i64, tpu.core_type = #tpu.core_type<tc>, window_params = [{transform_indices = @transform_0, window_bounds = array<i64: 16, 784>}, {pipeline_mode = #tpu.pipeline_mode<synchronous>, transform_indices = @transform_1, window_bounds = array<i64: 784, 150>}, {pipeline_mode = #tpu.pipeline_mode<synchronous>, transform_indices = @transform_2, window_bounds = array<i64: 1, 150>}, {pipeline_mode = #tpu.pipeline_mode<synchronous>, transform_indices = @transform_3, window_bounds = array<i64: 150, 128>}, {pipeline_mode = #tpu.pipeline_mode<synchronous>, transform_indices = @transform_4, window_bounds = array<i64: 1, 128>}, {transform_indices = @transform_5, window_bounds = array<i64: 16, 10>}]} {
    %c0 = arith.constant 0 : index
    %c0_0 = arith.constant 0 : index
    %0 = vector.load %arg1[%c0, %c0_0] : memref<16x784xf32, #tpu.memory_space<vmem>>, vector<16x784xf32>
    %1 = arith.truncf %0 : vector<16x784xf32> to vector<16x784xbf16>
    %c0_1 = arith.constant 0 : index
    %c0_2 = arith.constant 0 : index
    %2 = vector.load %arg2[%c0_1, %c0_2] : memref<784x150xbf16, #tpu.memory_space<vmem>>, vector<784x150xbf16>
    %cst = arith.constant dense<0.000000e+00> : vector<16x150xf32>
    %3 = tpu.matmul %1, %2, %cst {dimension_numbers = #tpu.dot_dimension_numbers<[1], [0], [0], [1], [0, 0, 1, 1], [], []>} : vector<16x784xbf16>, vector<784x150xbf16>, vector<16x150xf32> -> vector<16x150xf32>
    %c0_3 = arith.constant 0 : index
    %c0_4 = arith.constant 0 : index
    %4 = vector.load %arg3[%c0_3, %c0_4] : memref<1x150xf32, #tpu.memory_space<vmem>>, vector<1x150xf32>
    %5 = vector.broadcast %4 : vector<1x150xf32> to vector<16x150xf32>
    %6 = arith.addf %3, %5 : vector<16x150xf32>
    %7 = math.tanh %6 : vector<16x150xf32>
    %8 = arith.truncf %7 : vector<16x150xf32> to vector<16x150xbf16>
    %c0_5 = arith.constant 0 : index
    %c0_6 = arith.constant 0 : index
    %9 = vector.load %arg4[%c0_5, %c0_6] : memref<150x128xbf16, #tpu.memory_space<vmem>>, vector<150x128xbf16>
    %cst_7 = arith.constant dense<0.000000e+00> : vector<16x128xf32>
    %10 = tpu.matmul %8, %9, %cst_7 {dimension_numbers = #tpu.dot_dimension_numbers<[1], [0], [0], [1], [0, 0, 1, 1], [], []>} : vector<16x150xbf16>, vector<150x128xbf16>, vector<16x128xf32> -> vector<16x128xf32>
    %c0_8 = arith.constant 0 : index
    %c0_9 = arith.constant 0 : index
    %11 = vector.load %arg5[%c0_8, %c0_9] : memref<1x128xf32, #tpu.memory_space<vmem>>, vector<1x128xf32>
    %12 = vector.broadcast %11 : vector<1x128xf32> to vector<16x128xf32>
    %13 = arith.addf %10, %12 : vector<16x128xf32>
    %cst_10 = arith.constant dense<0xFF800000> : vector<16xf32>
    %14 = vector.multi_reduction <maximumf>, %13, %cst_10 [1] : vector<16x128xf32> to vector<16xf32>
    %15 = vector.shape_cast %14 : vector<16xf32> to vector<16x1xf32>
    %16 = vector.broadcast %15 : vector<16x1xf32> to vector<16x128xf32>
    %17 = arith.subf %13, %16 : vector<16x128xf32>
    %18 = math.exp %17 : vector<16x128xf32>
    %cst_11 = arith.constant dense<0.000000e+00> : vector<16xf32>
    %19 = vector.multi_reduction <add>, %18, %cst_11 [1] : vector<16x128xf32> to vector<16xf32>
    %20 = vector.shape_cast %19 : vector<16xf32> to vector<16x1xf32>
    %21 = math.log %20 : vector<16x1xf32>
    %22 = vector.broadcast %21 : vector<16x1xf32> to vector<16x128xf32>
    %23 = arith.subf %17, %22 : vector<16x128xf32>
    %24 = vector.extract_strided_slice %23 {offsets = [0, 0], sizes = [16, 10], strides = [1, 1]} : vector<16x128xf32> to vector<16x10xf32>
    %c0_12 = arith.constant 0 : index
    %c0_13 = arith.constant 0 : index
    %25 = vector.load %arg6[%c0_12, %c0_13] : memref<16x10xf32, #tpu.memory_space<vmem>>, vector<16x10xf32>
    tpu.vector_store %arg6[%c0_12, %c0_13], %24 {strides = array<i32>} : memref<16x10xf32, #tpu.memory_space<vmem>>, vector<16x10xf32>,
    return
  }
  func.func @transform_0(%arg0: i32) -> (i32, i32) {
    %c0_i32 = arith.constant 0 : i32
    %c0_i32_0 = arith.constant 0 : i32
    return %arg0, %c0_i32 : i32, i32
  }
  func.func @transform_1(%arg0: i32) -> (i32, i32) {
    %c0_i32 = arith.constant 0 : i32
    %c0_i32_0 = arith.constant 0 : i32
    %c0_i32_1 = arith.constant 0 : i32
    return %c0_i32, %c0_i32_0 : i32, i32
  }
  func.func @transform_2(%arg0: i32) -> (i32, i32) {
    %c0_i32 = arith.constant 0 : i32
    %c0_i32_0 = arith.constant 0 : i32
    %c0_i32_1 = arith.constant 0 : i32
    return %c0_i32, %c0_i32_0 : i32, i32
  }
  func.func @transform_3(%arg0: i32) -> (i32, i32) {
    %c0_i32 = arith.constant 0 : i32
    %c0_i32_0 = arith.constant 0 : i32
    %c0_i32_1 = arith.constant 0 : i32
    return %c0_i32, %c0_i32_0 : i32, i32
  }
  func.func @transform_4(%arg0: i32) -> (i32, i32) {
    %c0_i32 = arith.constant 0 : i32
    %c0_i32_0 = arith.constant 0 : i32
    %c0_i32_1 = arith.constant 0 : i32
    return %c0_i32, %c0_i32_0 : i32, i32
  }
  func.func @transform_5(%arg0: i32) -> (i32, i32) {
    %c0_i32 = arith.constant 0 : i32
    %c0_i32_0 = arith.constant 0 : i32
    return %arg0, %c0_i32 : i32, i32
  }
}

</mosaic_0001>

<bundles_post_ra>
// kernel: tpu_custom_call.1
= control target key start
LH: loop header
LB: loop body
LE: loop exit
PB: predicated region body
PF: predicated region fallthrough
CT: control target
= control target key end

     0   :  { %s1861_s18 = smov 0   ;;  %s2554_s0 = inlined_call_operand.vmem [shape: f32[32,784], index: 0, kind: input, shape index: {}]   ;;  %s2555_s1 = inlined_call_operand.vmem [shape: bf16[784,150], index: 1, kind: input, shape index: {}]   ;;  %s2556_s2 = inlined_call_operand.vmem [shape: f32[1,150], index: 2, kind: input, shape index: {}]   ;;  %s2557_s3 = inlined_call_operand.vmem [shape: bf16[150,128], index: 3, kind: input, shape index: {}]   ;;  %s2558_s4 = inlined_call_operand.vmem [shape: f32[1,128], index: 4, kind: input, shape index: {}]   ;;  %s2559_s5 = inlined_call_operand.vmem [shape: f32[32,10], index: 5, kind: output, shape index: {}]  }
   0x1 LB: > { %s1248_s19 = sadd.s32 4294967295, %s1829_s18   ;;  %p1252_p0 = scmp.ge.s32.totalorder %s1829_s18, 1  ;;  %s1829_s18 = sphi %s1861_s18, %s15_s18  }
   0x2   : > { %p189_p1 = scmp.lt.s32.totalorder %s1829_s18, 3 }
   0x4   : > { %p190_p2 = pnand %p1252_p0, %p189_p1 }
   0x5   : > { %s1253_s21 = sshll.u32 (!%p190_p2), %s1248_s19, 1 }
   0x6   : > { %193 = sbr.rel (%p190_p2) target bundleno = 667 (0x29b), region = 40  ;;  %p219_p3 = scmp.lt.s32.totalorder (!%p190_p2), %s1253_s21, 3 }
   0xb   : > { %v1315_v0 = vld [vmem:[%s2555_s1 + $0x70] sm:$0xf]  ;;  %v1705_v1 = vld [vmem:[%s2555_s1 + $0x74] sm:$0xf0]  ;;  %v1307_v11 = vld [vmem:[%s2555_s1 + $0x60] sm:$0xf] }
   0xc   : > { %v1443_v2 = vld [vmem:[%s2555_s1 + $0x170] sm:$0xf]  ;;  %v1316_v3 = vor.u32 %v1705_v1, %v1315_v0  ;;  %v1737_v4 = vld [vmem:[%s2555_s1 + $0x174] sm:$0xf0]  ;;  %v1703_v13 = vld [vmem:[%s2555_s1 + $0x64] sm:$0xf0] }
   0xd   : > { %v1507_v5 = vld [vmem:[%s2555_s1 + $0x1f0] sm:$0xf]  ;;  %v1753_v6 = vld [vmem:[%s2555_s1 + $0x1f4] sm:$0xf0]  ;;  %v1444_v7 = vor.u32 %v1737_v4, %v1443_v2  ;;  %v1435_v14 = vld [vmem:[%s2555_s1 + $0x160] sm:$0xf]  ;;  %v1308_v16 = vor.u32 %v1703_v13, %v1307_v11 }
   0xe   : > { %v1508_v8 = vor.u32 %v1753_v6, %v1507_v5  ;;  %v1379_v9 = vld [vmem:[%s2555_s1 + $0xf0] sm:$0xf]  ;;  %v1721_v10 = vld [vmem:[%s2555_s1 + $0xf4] sm:$0xf0]  ;;  %851 = vmatpush.bf16.msra.mxu0 %v1316_v3  ;;  %v1735_v15 = vld [vmem:[%s2555_s1 + $0x164] sm:$0xf0] }
   0xf   : > { %v1380_v12 = vor.u32 %v1721_v10, %v1379_v9  ;;  %879 = vmatpush.bf16.msra.mxu2 %v1444_v7  ;;  %v1436_v17 = vor.u32 %v1735_v15, %v1435_v14  ;;  %v1499_v18 = vld [vmem:[%s2555_s1 + $0x1e0] sm:$0xf]  ;;  %v1751_v19 = vld [vmem:[%s2555_s1 + $0x1e4] sm:$0xf0]  ;;  %v1299_v23 = vld [vmem:[%s2555_s1 + $0x50] sm:$0xf] }
  0x10   : > { %893 = vmatpush.bf16.msra.mxu3 %v1508_v8  ;;  %v1371_v20 = vld [vmem:[%s2555_s1 + $0xe0] sm:$0xf]  ;;  %v1500_v21 = vor.u32 %v1751_v19, %v1499_v18  ;;  %v1719_v22 = vld [vmem:[%s2555_s1 + $0xe4] sm:$0xf0]  ;;  %v1701_v24 = vld [vmem:[%s2555_s1 + $0x54] sm:$0xf0] }
  0x11   : > { %865 = vmatpush.bf16.msra.mxu1 %v1380_v12  ;;  %v1372_v25 = vor.u32 %v1719_v22, %v1371_v20  ;;  %v1427_v26 = vld [vmem:[%s2555_s1 + $0x150] sm:$0xf]  ;;  %v1733_v27 = vld [vmem:[%s2555_s1 + $0x154] sm:$0xf0]  ;;  %v1300_v29 = vor.u32 %v1701_v24, %v1299_v23  ;;  %v1291_v35 = vld [vmem:[%s2555_s1 + $0x40] sm:$0xf] }
  0x12   : > { %v1491_v28 = vld [vmem:[%s2555_s1 + $0x1d0] sm:$0xf]  ;;  %852 = vmatpush.bf16.msra.mxu0 %v1308_v16  ;;  %v1749_v30 = vld [vmem:[%s2555_s1 + $0x1d4] sm:$0xf0]  ;;  %v1428_v33 = vor.u32 %v1733_v27, %v1427_v26  ;;  %v1699_v36 = vld [vmem:[%s2555_s1 + $0x44] sm:$0xf0] }
  0x13   : > { %v1363_v31 = vld [vmem:[%s2555_s1 + $0xd0] sm:$0xf]  ;;  %v1717_v32 = vld [vmem:[%s2555_s1 + $0xd4] sm:$0xf0]  ;;  %880 = vmatpush.bf16.msra.mxu2 %v1436_v17  ;;  %v1492_v34 = vor.u32 %v1749_v30, %v1491_v28  ;;  %v1419_v37 = vld [vmem:[%s2555_s1 + $0x140] sm:$0xf]  ;;  %v1292_v44 = vor.u32 %v1699_v36, %v1291_v35 }
  0x14   : > { %894 = vmatpush.bf16.msra.mxu3 %v1500_v21  ;;  %v1364_v38 = vor.u32 %v1717_v32, %v1363_v31  ;;  %v1731_v39 = vld [vmem:[%s2555_s1 + $0x144] sm:$0xf0]  ;;  %v1483_v40 = vld [vmem:[%s2555_s1 + $0x1c0] sm:$0xf]  ;;  %v1283_v47 = vld [vmem:[%s2555_s1 + $0x30] sm:$0xf] }
  0x15   : > { %866 = vmatpush.bf16.msra.mxu1 %v1372_v25  ;;  %v1747_v41 = vld [vmem:[%s2555_s1 + $0x1c4] sm:$0xf0]  ;;  %v1355_v42 = vld [vmem:[%s2555_s1 + $0xc0] sm:$0xf]  ;;  %v1420_v45 = vor.u32 %v1731_v39, %v1419_v37  ;;  %v1697_v48 = vld [vmem:[%s2555_s1 + $0x34] sm:$0xf0] }
  0x16   : > { %v1715_v43 = vld [vmem:[%s2555_s1 + $0xc4] sm:$0xf0]  ;;  %853 = vmatpush.bf16.msra.mxu0 %v1300_v29  ;;  %v1484_v46 = vor.u32 %v1747_v41, %v1483_v40  ;;  %v1411_v49 = vld [vmem:[%s2555_s1 + $0x130] sm:$0xf]  ;;  %v1729_v51 = vld [vmem:[%s2555_s1 + $0x134] sm:$0xf0]  ;;  %v1284_v56 = vor.u32 %v1697_v48, %v1283_v47 }
  0x17   : > { %881 = vmatpush.bf16.msra.mxu2 %v1428_v33  ;;  %v1356_v50 = vor.u32 %v1715_v43, %v1355_v42  ;;  %v1475_v52 = vld [vmem:[%s2555_s1 + $0x1b0] sm:$0xf]  ;;  %v1745_v53 = vld [vmem:[%s2555_s1 + $0x1b4] sm:$0xf0]  ;;  %v1412_v57 = vor.u32 %v1729_v51, %v1411_v49  ;;  %v1275_v59 = vld [vmem:[%s2555_s1 + $0x20] sm:$0xf] }
  0x18   : > { %895 = vmatpush.bf16.msra.mxu3 %v1492_v34  ;;  %v1347_v54 = vld [vmem:[%s2555_s1 + $0xb0] sm:$0xf]  ;;  %v1713_v55 = vld [vmem:[%s2555_s1 + $0xb4] sm:$0xf0]  ;;  %v1476_v58 = vor.u32 %v1745_v53, %v1475_v52  ;;  %v1695_v60 = vld [vmem:[%s2555_s1 + $0x24] sm:$0xf0] }
  0x19   : > { %867 = vmatpush.bf16.msra.mxu1 %v1364_v38  ;;  %v1403_v61 = vld [vmem:[%s2555_s1 + $0x120] sm:$0xf]  ;;  %v1348_v62 = vor.u32 %v1713_v55, %v1347_v54  ;;  %v1727_v63 = vld [vmem:[%s2555_s1 + $0x124] sm:$0xf0]  ;;  %v1276_v4 = vor.u32 %v1695_v60, %v1275_v59  ;;  %v1267_v5 = vld [vmem:[%s2555_s1 + $0x10] sm:$0xf] }
  0x1a   : > { %854 = vmatpush.bf16.msra.mxu0 %v1292_v44  ;;  %v1467_v0 = vld [vmem:[%s2555_s1 + $0x1a0] sm:$0xf]  ;;  %v1743_v1 = vld [vmem:[%s2555_s1 + $0x1a4] sm:$0xf0]  ;;  %v1693_v6 = vld [vmem:[%s2555_s1 + $0x14] sm:$0xf0]  ;;  %v1404_v7 = vor.u32 %v1727_v63, %v1403_v61 }
  0x1b   : > { %882 = vmatpush.bf16.msra.mxu2 %v1420_v45  ;;  %v1339_v2 = vld [vmem:[%s2555_s1 + $0xa0] sm:$0xf]  ;;  %v1711_v3 = vld [vmem:[%s2555_s1 + $0xa4] sm:$0xf0]  ;;  %v1468_v8 = vor.u32 %v1743_v1, %v1467_v0  ;;  %v1395_v9 = vld [vmem:[%s2555_s1 + $0x110] sm:$0xf]  ;;  %v1268_v18 = vor.u32 %v1693_v6, %v1267_v5 }
  0x1c   : > { %896 = vmatpush.bf16.msra.mxu3 %v1484_v46  ;;  %v1725_v10 = vld [vmem:[%s2555_s1 + $0x114] sm:$0xf0]  ;;  %v1459_v11 = vld [vmem:[%s2555_s1 + $0x190] sm:$0xf]  ;;  %v1340_v12 = vor.u32 %v1711_v3, %v1339_v2  ;;  %v1259_v16 = vld [vmem:[%s2555_s1] sm:$0xf] }
  0x1d   : > { %868 = vmatpush.bf16.msra.mxu1 %v1356_v50  ;;  %v1741_v13 = vld [vmem:[%s2555_s1 + $0x194] sm:$0xf0]  ;;  %v1331_v14 = vld [vmem:[%s2555_s1 + $0x90] sm:$0xf]  ;;  %v1691_v17 = vld [vmem:[%s2555_s1 + $0x4] sm:$0xf0]  ;;  %v1396_v23 = vor.u32 %v1725_v10, %v1395_v9 }
  0x1e   : > { %855 = vmatpush.bf16.msra.mxu0 %v1284_v56  ;;  %v1709_v15 = vld [vmem:[%s2555_s1 + $0x94] sm:$0xf0]  ;;  %v1387_v19 = vld [vmem:[%s2555_s1 + $0x100] sm:$0xf]  ;;  %v1723_v20 = vld [vmem:[%s2555_s1 + $0x104] sm:$0xf0]  ;;  %v1460_v24 = vor.u32 %v1741_v13, %v1459_v11  ;;  %v1260_v34 = vor.u32 %v1691_v17, %v1259_v16 }
  0x1f   : > { %883 = vmatpush.bf16.msra.mxu2 %v1412_v57  ;;  %v1451_v21 = vld [vmem:[%s2555_s1 + $0x180] sm:$0xf]  ;;  %v1739_v22 = vld [vmem:[%s2555_s1 + $0x184] sm:$0xf0]  ;;  %v1571_v25 = vld [vmem:[%s2555_s1 + $0x270] sm:$0xf]  ;;  %v1332_v28 = vor.u32 %v1709_v15, %v1331_v14  ;;  %v1388_v37 = vor.u32 %v1723_v20, %v1387_v19 }
  0x20   : > { %897 = vmatpush.bf16.msra.mxu3 %v1476_v58  ;;  %v1769_v26 = vld [vmem:[%s2555_s1 + $0x274] sm:$0xf0]  ;;  %v1704_v27 = vld [vmem:[%s2555_s1 + $0x74] sm:$0xf]  ;;  %v1317_v29 = vld [vmem:[%s2555_s1 + $0x78] sm:$0xf0]  ;;  %v1452_v38 = vor.u32 %v1739_v22, %v1451_v21 }
  0x21   : > { %869 = vmatpush.bf16.msra.mxu1 %v1348_v62  ;;  %v1323_v30 = vld [vmem:[%s2555_s1 + $0x80] sm:$0xf]  ;;  %s2561_s21 = smov (!%p219_p3, %s1253_s21), 3  ;;  %v1707_v31 = vld [vmem:[%s2555_s1 + $0x84] sm:$0xf0]  ;;  %v1572_v42 = vor.u32 %v1769_v26, %v1571_v25  ;;  %v1320_v43 = vor.u32 %v1704_v27, %v1317_v29  ;;  %vm847_vm0 = vcmask 130048  }
  0x22   : > { %856 = vmatpush.bf16.msra.mxu0 %v1276_v4  ;;  %v1635_v32 = vld [vmem:[%s2555_s1 + $0x2f0] sm:$0xf]  ;;  %v1785_v33 = vld [vmem:[%s2555_s1 + $0x2f4] sm:$0xf0]  ;;  %s1797_s23 = smul.u32 56, %s2561_s21  ;;  %v1324_v47 = vor.u32 %v1707_v31, %v1323_v30  ;;  %vm1137_vm1 = vcmask 1042432  }
  0x23   : > { %884 = vmatpush.bf16.msra.mxu2 %v1404_v7  ;;  %v1643_v35 = vld [vmem:[%s2555_s1 + $0x300] sm:$0xf]  ;;  %v1787_v36 = vld [vmem:[%s2555_s1 + $0x304] sm:$0xf0]  ;;  %v1720_v39 = vld [vmem:[%s2555_s1 + $0xf4] sm:$0xf]  ;;  %v1636_v54 = vor.u32 %v1785_v33, %v1635_v32 }
  0x24   : > { %898 = vmatpush.bf16.msra.mxu3 %v1468_v8  ;;  %v1381_v40 = vld [vmem:[%s2555_s1 + $0xf8] sm:$0xf0]  ;;  %v1563_v41 = vld [vmem:[%s2555_s1 + $0x260] sm:$0xf]  ;;  %s2102_s10 = scalar_lea.vmem %s2554_s0, %s1797_s23  ;;  %v1767_v44 = vld [vmem:[%s2555_s1 + $0x264] sm:$0xf0]  ;;  %v1644_v50 = vor.u32 %v1787_v36, %v1643_v35 }
  0x25   : > { %870 = vmatpush.bf16.msra.mxu1 %v1340_v12  ;;  %v1702_v45 = vld [vmem:[%s2555_s1 + $0x64] sm:$0xf]  ;;  %v1309_v46 = vld [vmem:[%s2555_s1 + $0x68] sm:$0xf0]  ;;  %v234_v48 = vld [vmem:[%s2102_s10 + $0x10] sm:$0xff]  ;;  %v1384_v58 = vor.u32 %v1720_v39, %v1381_v40  ;;  %v1564_v0 = vor.u32 %v1767_v44, %v1563_v41  ;;  %vm1133_vm2 = vcmask 179200  }
  0x26   : > { %857 = vmatpush.bf16.msra.mxu0 %v1268_v18  ;;  %v241_v49 = vld [vmem:[%s2102_s10 + $0x48] sm:$0xff]  ;;  %v232_v51 = vld [vmem:[%s2102_s10] sm:$0xff]  ;;  %v239_v55 = vld [vmem:[%s2102_s10 + $0x38] sm:$0xff]  ;;  %v1312_v3 = vor.u32 %v1702_v45, %v1309_v46  ;;  %s1256_s6 = sshll.u32 %s2561_s21, 3  ;;  %vm1189_vm3 = vcmask 80896  }
  0x27   : > { %885 = vmatpush.bf16.msra.mxu2 %v1396_v23  ;;  %v1627_v52 = vld [vmem:[%s2555_s1 + $0x2e0] sm:$0xf]  ;;  %v2119_v53 = vpack.c.bf16 %v241_v49, %v234_v48  ;;  %v235_v56 = vld [vmem:[%s2102_s10 + $0x18] sm:$0xff]  ;;  %v242_v57 = vld [vmem:[%s2102_s10 + $0x50] sm:$0xff]  ;;  %v2124_v59 = vpack.c.bf16 %v239_v55, %v232_v51  ;;  %s229_s9 = scalar_lea.vmem %s2559_s5, %s1256_s6 }
  0x28   : > { %899 = vmatpush.bf16.msra.mxu3 %v1460_v24  ;;  %v233_v60 = vld [vmem:[%s2102_s10 + $0x8] sm:$0xff]  ;;  %v240_v61 = vld [vmem:[%s2102_s10 + $0x40] sm:$0xff]  ;;  %v2131_v63 = vpack.c.bf16 %v242_v57, %v235_v56  ;;  %v1555_v5 = vld [vmem:[%s2555_s1 + $0x250] sm:$0xf] }
  0x29   : > { %871 = vmatpush.bf16.msra.mxu1 %v1332_v28  ;;  %v1783_v62 = vld [vmem:[%s2555_s1 + $0x2e4] sm:$0xf0]  ;;  %v1718_v1 = vld [vmem:[%s2555_s1 + $0xe4] sm:$0xf]  ;;  %v1373_v2 = vld [vmem:[%s2555_s1 + $0xe8] sm:$0xf0]  ;;  %v2139_v4 = vpack.c.bf16 %v240_v61, %v233_v60 }
  0x2a   : > { %858 = vmatpush.bf16.msra.mxu0 %v1260_v34  ;;  %v1765_v6 = vld [vmem:[%s2555_s1 + $0x254] sm:$0xf0]  ;;  %v1628_v7 = vor.u32 %v1783_v62, %v1627_v52  ;;  %v1700_v8 = vld [vmem:[%s2555_s1 + $0x54] sm:$0xf]  ;;  %v1301_v9 = vld [vmem:[%s2555_s1 + $0x58] sm:$0xf0]  ;;  %v1376_v10 = vor.u32 %v1718_v1, %v1373_v2 }
  0x2b   : > { %886 = vmatpush.bf16.msra.mxu2 %v1388_v37  ;;  %v1619_v11 = vld [vmem:[%s2555_s1 + $0x2d0] sm:$0xf]  ;;  %v1781_v12 = vld [vmem:[%s2555_s1 + $0x2d4] sm:$0xf0]  ;;  %v1556_v13 = vor.u32 %v1765_v6, %v1555_v5  ;;  %v1716_v14 = vld [vmem:[%s2555_s1 + $0xd4] sm:$0xf]  ;;  %v1304_v16 = vor.u32 %v1700_v8, %v1301_v9 }
  0x2c   : > { %900 = vmatpush.bf16.msra.mxu3 %v1452_v38  ;;  %v1365_v15 = vld [vmem:[%s2555_s1 + $0xd8] sm:$0xf0]  ;;  %v1547_v17 = vld [vmem:[%s2555_s1 + $0x240] sm:$0xf]  ;;  %v1763_v18 = vld [vmem:[%s2555_s1 + $0x244] sm:$0xf0]  ;;  %v1620_v19 = vor.u32 %v1781_v12, %v1619_v11 }
  0x2d   : > { %872 = vmatpush.bf16.msra.mxu1 %v1324_v47  ;;  %859 = vmatmul.bf16.vlgmr.msra.gmra.mxu0 %v2124_v59  ;;  %v1698_v20 = vld [vmem:[%s2555_s1 + $0x44] sm:$0xf]  ;;  %v1293_v21 = vld [vmem:[%s2555_s1 + $0x48] sm:$0xf0]  ;;  %v1368_v22 = vor.u32 %v1716_v14, %v1365_v15  ;;  %v1611_v23 = vld [vmem:[%s2555_s1 + $0x2c0] sm:$0xf]  ;;  %v1548_v25 = vor.u32 %v1763_v18, %v1547_v17 }
  0x2e   : > { %907 = vmatpush.bf16.msrb.mxu0 %v1572_v42  ;;  %887 = vmatmul.bf16.vlgmr.msra.gmra.mxu2 %v2119_v53  ;;  %v1779_v24 = vld [vmem:[%s2555_s1 + $0x2c4] sm:$0xf0]  ;;  %v1714_v26 = vld [vmem:[%s2555_s1 + $0xc4] sm:$0xf]  ;;  %v1357_v27 = vld [vmem:[%s2555_s1 + $0xc8] sm:$0xf0]  ;;  %v1296_v28 = vor.u32 %v1698_v20, %v1293_v21 }
  0x2f   : > { %942 = vmatpush.bf16.msrb.mxu2 %v1644_v50  ;;  %901 = vmatmul.bf16.vlgmr.msra.gmra.mxu3 %v2131_v63  ;;  %v1539_v29 = vld [vmem:[%s2555_s1 + $0x230] sm:$0xf]  ;;  %v1761_v30 = vld [vmem:[%s2555_s1 + $0x234] sm:$0xf0]  ;;  %v1612_v31 = vor.u32 %v1779_v24, %v1611_v23  ;;  %v1696_v32 = vld [vmem:[%s2555_s1 + $0x34] sm:$0xf]  ;;  %v1360_v34 = vor.u32 %v1714_v26, %v1357_v27 }
  0x30   : > { %949 = vmatpush.bf16.msrb.mxu3 %v1320_v43  ;;  %873 = vmatmul.bf16.vlgmr.msra.gmra.mxu1 %v2139_v4  ;;  %v1285_v33 = vld [vmem:[%s2555_s1 + $0x38] sm:$0xf0]  ;;  %v1603_v35 = vld [vmem:[%s2555_s1 + $0x2b0] sm:$0xf]  ;;  %v1777_v36 = vld [vmem:[%s2555_s1 + $0x2b4] sm:$0xf0]  ;;  %v1540_v38 = vor.u32 %v1761_v30, %v1539_v29 }
  0x31   : > { %921 = vmatpush.bf16.msrb.mxu1 %v1636_v54  ;;  %v1712_v37 = vld [vmem:[%s2555_s1 + $0xb4] sm:$0xf]  ;;  %v1349_v39 = vld [vmem:[%s2555_s1 + $0xb8] sm:$0xf0]  ;;  %v245_v41 = vld [vmem:[%s2102_s10 + $0x68] sm:$0xff]  ;;  %v1288_v42 = vor.u32 %v1696_v32, %v1285_v33  ;;  %v1604_v45 = vor.u32 %v1777_v36, %v1603_v35 }
  0x32   : > { %908 = vmatpush.bf16.msrb.mxu0 %v1564_v0  ;;  %v238_v40 = vld [vmem:[%s2102_s10 + $0x30] sm:$0xff]  ;;  %v1531_v43 = vld [vmem:[%s2555_s1 + $0x220] sm:$0xf]  ;;  %v1759_v44 = vld [vmem:[%s2555_s1 + $0x224] sm:$0xf0]  ;;  %v1352_v49 = vor.u32 %v1712_v37, %v1349_v39 }
  0x33   : > { %963 = vmatpush.bf16.msra.mxu2 %v1384_v58  ;;  %v1694_v46 = vld [vmem:[%s2555_s1 + $0x24] sm:$0xf]  ;;  %v1277_v47 = vld [vmem:[%s2555_s1 + $0x28] sm:$0xf0]  ;;  %v2231_v48 = vpack.c.bf16 %v245_v41, %v238_v40  ;;  %v1595_v50 = vld [vmem:[%s2555_s1 + $0x2a0] sm:$0xf]  ;;  %v1532_v52 = vor.u32 %v1759_v44, %v1531_v43 }
  0x34   : > { %950 = vmatpush.bf16.msrb.mxu3 %v1312_v3  ;;  %v1775_v51 = vld [vmem:[%s2555_s1 + $0x2a4] sm:$0xf0]  ;;  %v1710_v54 = vld [vmem:[%s2555_s1 + $0xa4] sm:$0xf]  ;;  %v1341_v55 = vld [vmem:[%s2555_s1 + $0xa8] sm:$0xf0]  ;;  %v1280_v56 = vor.u32 %v1694_v46, %v1277_v47 }
  0x35   : > { %922 = vmatpush.bf16.msrb.mxu1 %v1628_v7  ;;  %v1523_v57 = vld [vmem:[%s2555_s1 + $0x210] sm:$0xf]  ;;  %v1757_v58 = vld [vmem:[%s2555_s1 + $0x214] sm:$0xf0]  ;;  %v1692_v60 = vld [vmem:[%s2555_s1 + $0x14] sm:$0xf]  ;;  %v1596_v61 = vor.u32 %v1775_v51, %v1595_v50  ;;  %v1344_v2 = vor.u32 %v1710_v54, %v1341_v55 }
  0x36   : > { %909 = vmatpush.bf16.msrb.mxu0 %v1556_v13  ;;  %v1269_v62 = vld [vmem:[%s2555_s1 + $0x18] sm:$0xf0]  ;;  %v1587_v0 = vld [vmem:[%s2555_s1 + $0x290] sm:$0xf]  ;;  %v1773_v1 = vld [vmem:[%s2555_s1 + $0x294] sm:$0xf0]  ;;  %v1524_v7 = vor.u32 %v1757_v58, %v1523_v57 }
  0x37   : > { %964 = vmatpush.bf16.msra.mxu2 %v1376_v10  ;;  %v1708_v3 = vld [vmem:[%s2555_s1 + $0x94] sm:$0xf]  ;;  %v1333_v5 = vld [vmem:[%s2555_s1 + $0x98] sm:$0xf0]  ;;  %v1515_v6 = vld [vmem:[%s2555_s1 + $0x200] sm:$0xf]  ;;  %v1272_v11 = vor.u32 %v1692_v60, %v1269_v62  ;;  %v1588_v15 = vor.u32 %v1773_v1, %v1587_v0 }
  0x38   : > { %951 = vmatpush.bf16.msrb.mxu3 %v1304_v16  ;;  %v1755_v8 = vld [vmem:[%s2555_s1 + $0x204] sm:$0xf0]  ;;  %v1690_v9 = vld [vmem:[%s2555_s1 + $0x4] sm:$0xf]  ;;  %v1261_v10 = vld [vmem:[%s2555_s1 + $0x8] sm:$0xf0] }
  0x39   : > { %923 = vmatpush.bf16.msrb.mxu1 %v1620_v19  ;;  %v1736_v12 = vld [vmem:[%s2555_s1 + $0x174] sm:$0xf]  ;;  %v1445_v13 = vld [vmem:[%s2555_s1 + $0x178] sm:$0xf0]  ;;  %v1579_v17 = vld [vmem:[%s2555_s1 + $0x280] sm:$0xf]  ;;  %v1336_v19 = vor.u32 %v1708_v3, %v1333_v5  ;;  %v1516_v23 = vor.u32 %v1755_v8, %v1515_v6  ;;  %v1264_v27 = vor.u32 %v1690_v9, %v1261_v10 }
  0x3a   : > { %910 = vmatpush.bf16.msrb.mxu0 %v1548_v25  ;;  %v1768_v14 = vld [vmem:[%s2555_s1 + $0x274] sm:$0xf]  ;;  %v1573_v16 = vld [vmem:[%s2555_s1 + $0x278] sm:$0xf0]  ;;  %v1771_v18 = vld [vmem:[%s2555_s1 + $0x284] sm:$0xf0] }
  0x3b   : > { %965 = vmatpush.bf16.msra.mxu2 %v1368_v22  ;;  %v236_v20 = vld [vmem:[%s2102_s10 + $0x20] sm:$0xff]  ;;  %v243_v21 = vld [vmem:[%s2102_s10 + $0x58] sm:$0xff]  ;;  %v1325_v24 = vld [vmem:[%s2555_s1 + $0x88] sm:$0xf0]  ;;  %v1576_v32 = vor.u32 %v1768_v14, %v1573_v16  ;;  %v1580_v33 = vor.u32 %v1771_v18, %v1579_v17 }
  0x3c   : > { %952 = vmatpush.bf16.msrb.mxu3 %v1296_v28  ;;  %v1706_v22 = vld [vmem:[%s2555_s1 + $0x84] sm:$0xf]  ;;  %v1752_v25 = vld [vmem:[%s2555_s1 + $0x1f4] sm:$0xf]  ;;  %v1509_v26 = vld [vmem:[%s2555_s1 + $0x1f8] sm:$0xf0]  ;;  %v1448_v28 = vor.u32 %v1736_v12, %v1445_v13  ;;  %v2329_v37 = vpack.c.bf16 %v243_v21, %v236_v20 }
  0x3d   : > { %924 = vmatpush.bf16.msrb.mxu1 %v1612_v31  ;;  %v1784_v29 = vld [vmem:[%s2555_s1 + $0x2f4] sm:$0xf]  ;;  %v1637_v30 = vld [vmem:[%s2555_s1 + $0x2f8] sm:$0xf0]  ;;  %v237_v31 = vld [vmem:[%s2102_s10 + $0x28] sm:$0xff]  ;;  %v1512_v41 = vor.u32 %v1752_v25, %v1509_v26 }
  0x3e   : > { %911 = vmatpush.bf16.msrb.mxu0 %v1540_v38  ;;  %1649 = vmatmul.msk.bf16.vlgmr.msrb.gmra.mxu2 %vm847_vm0, %v2231_v48  ;;  %v1734_v35 = vld [vmem:[%s2555_s1 + $0x164] sm:$0xf]  ;;  %v1437_v36 = vld [vmem:[%s2555_s1 + $0x168] sm:$0xf0]  ;;  %v1328_v38 = vor.u32 %v1706_v22, %v1325_v24  ;;  %v1732_v51 = vld [vmem:[%s2555_s1 + $0x154] sm:$0xf] }
  0x3f   : > { %966 = vmatpush.bf16.msra.mxu2 %v1360_v34  ;;  %v244_v34 = vld [vmem:[%s2102_s10 + $0x60] sm:$0xff]  ;;  %v1565_v40 = vld [vmem:[%s2555_s1 + $0x268] sm:$0xf0]  ;;  %v1764_v54 = vld [vmem:[%s2555_s1 + $0x254] sm:$0xf] }
  0x40   : > { %953 = vmatpush.bf16.msrb.mxu3 %v1288_v42  ;;  %v1766_v39 = vld [vmem:[%s2555_s1 + $0x264] sm:$0xf]  ;;  %v1640_v42 = vor.u32 %v1784_v29, %v1637_v30  ;;  %v2340_v44 = vpack.c.bf16 %v244_v34, %v237_v31  ;;  %v1501_v46 = vld [vmem:[%s2555_s1 + $0x1e8] sm:$0xf0]  ;;  %v1557_v55 = vld [vmem:[%s2555_s1 + $0x258] sm:$0xf0] }
  0x41   : > { %925 = vmatpush.bf16.msrb.mxu1 %v1604_v45  ;;  %v1750_v43 = vld [vmem:[%s2555_s1 + $0x1e4] sm:$0xf]  ;;  %v1440_v45 = vor.u32 %v1734_v35, %v1437_v36  ;;  %v1568_v50 = vor.u32 %v1766_v39, %v1565_v40  ;;  %v1748_v58 = vld [vmem:[%s2555_s1 + $0x1d4] sm:$0xf]  ;;  %v1621_v0 = vld [vmem:[%s2555_s1 + $0x2d8] sm:$0xf0]  ;;  %v1560_v1 = vor.u32 %v1764_v54, %v1557_v55 }
  0x42   : > { %912 = vmatpush.bf16.msrb.mxu0 %v1532_v52  ;;  %v1782_v47 = vld [vmem:[%s2555_s1 + $0x2e4] sm:$0xf]  ;;  %v1429_v52 = vld [vmem:[%s2555_s1 + $0x158] sm:$0xf0]  ;;  %v1780_v62 = vld [vmem:[%s2555_s1 + $0x2d4] sm:$0xf] }
  0x43   : > { %967 = vmatpush.bf16.msra.mxu2 %v1352_v49  ;;  %v1629_v49 = vld [vmem:[%s2555_s1 + $0x2e8] sm:$0xf0]  ;;  %v1432_v60 = vor.u32 %v1732_v51, %v1429_v52  ;;  %v1762_v5 = vld [vmem:[%s2555_s1 + $0x244] sm:$0xf]  ;;  %v1624_v8 = vor.u32 %v1780_v62, %v1621_v0  ;;  %v1728_v13 = vld [vmem:[%s2555_s1 + $0x134] sm:$0xf] }
  0x44   : > { %954 = vmatpush.bf16.msrb.mxu3 %v1280_v56  ;;  %v1504_v56 = vor.u32 %v1750_v43, %v1501_v46  ;;  %v1632_v57 = vor.u32 %v1782_v47, %v1629_v49  ;;  %v1421_v3 = vld [vmem:[%s2555_s1 + $0x148] sm:$0xf0]  ;;  %v1746_v9 = vld [vmem:[%s2555_s1 + $0x1c4] sm:$0xf]  ;;  %v1413_v14 = vld [vmem:[%s2555_s1 + $0x138] sm:$0xf0] }
  0x45   : > { %926 = vmatpush.bf16.msrb.mxu1 %v1596_v61  ;;  %v1493_v61 = vld [vmem:[%s2555_s1 + $0x1d8] sm:$0xf0]  ;;  %v1549_v6 = vld [vmem:[%s2555_s1 + $0x248] sm:$0xf0]  ;;  %v1416_v20 = vor.u32 %v1728_v13, %v1413_v14  ;;  %v1776_v22 = vld [vmem:[%s2555_s1 + $0x2b4] sm:$0xf] }
  0x46   : > { %913 = vmatpush.bf16.msrb.mxu0 %v1524_v7  ;;  %v1496_v7 = vor.u32 %v1748_v58, %v1493_v61  ;;  %v1485_v10 = vld [vmem:[%s2555_s1 + $0x1c8] sm:$0xf0]  ;;  %v1552_v12 = vor.u32 %v1762_v5, %v1549_v6  ;;  %v1541_v16 = vld [vmem:[%s2555_s1 + $0x238] sm:$0xf0]  ;;  %v1726_v25 = vld [vmem:[%s2555_s1 + $0x124] sm:$0xf] }
  0x47   : > { %968 = vmatpush.bf16.msra.mxu2 %v1344_v2  ;;  %v1730_v2 = vld [vmem:[%s2555_s1 + $0x144] sm:$0xf]  ;;  %v1488_v17 = vor.u32 %v1746_v9, %v1485_v10  ;;  %v1477_v21 = vld [vmem:[%s2555_s1 + $0x1b8] sm:$0xf0]  ;;  %v1405_v26 = vld [vmem:[%s2555_s1 + $0x128] sm:$0xf0] }
  0x48   : > { %955 = vmatpush.bf16.msrb.mxu3 %v1272_v11  ;;  %v1778_v11 = vld [vmem:[%s2555_s1 + $0x2c4] sm:$0xf]  ;;  %v1597_v35 = vld [vmem:[%s2555_s1 + $0x2a8] sm:$0xf0]  ;;  %v1397_v39 = vld [vmem:[%s2555_s1 + $0x118] sm:$0xf0] }
  0x49   : > { %927 = vmatpush.bf16.msrb.mxu1 %v1588_v15  ;;  %v1760_v15 = vld [vmem:[%s2555_s1 + $0x234] sm:$0xf]  ;;  %v1742_v31 = vld [vmem:[%s2555_s1 + $0x1a4] sm:$0xf]  ;;  %v1461_v47 = vld [vmem:[%s2555_s1 + $0x198] sm:$0xf0] }
  0x4a   : > { %914 = vmatpush.bf16.msrb.mxu0 %v1516_v23  ;;  %v1605_v23 = vld [vmem:[%s2555_s1 + $0x2b8] sm:$0xf0]  ;;  %v1544_v24 = vor.u32 %v1760_v15, %v1541_v16  ;;  %v1774_v34 = vld [vmem:[%s2555_s1 + $0x2a4] sm:$0xf]  ;;  %v1756_v40 = vld [vmem:[%s2555_s1 + $0x214] sm:$0xf] }
  0x4b   : > { %969 = vmatpush.bf16.msra.mxu2 %v1336_v19  ;;  %v1744_v19 = vld [vmem:[%s2555_s1 + $0x1b4] sm:$0xf]  ;;  %v1608_v30 = vor.u32 %v1776_v22, %v1605_v23  ;;  %v1600_v43 = vor.u32 %v1774_v34, %v1597_v35  ;;  %v1722_v52 = vld [vmem:[%s2555_s1 + $0x104] sm:$0xf]  ;;  %v1389_v54 = vld [vmem:[%s2555_s1 + $0x108] sm:$0xf0] }
  0x4c   : > { %956 = vmatpush.bf16.msrb.mxu3 %v1264_v27  ;;  %v1758_v27 = vld [vmem:[%s2555_s1 + $0x224] sm:$0xf]  ;;  %v1480_v29 = vor.u32 %v1744_v19, %v1477_v21  ;;  %v1772_v49 = vld [vmem:[%s2555_s1 + $0x294] sm:$0xf]  ;;  %v1645_v58 = vld [vmem:[%s2555_s1 + $0x308] sm:$0xf0]  ;;  %v1392_v62 = vor.u32 %v1722_v52, %v1389_v54 }
  0x4d   : > { %928 = vmatpush.bf16.msrb.mxu1 %v1580_v33  ;;  %915 = vmatmul.bf16.vlgmr.msrb.gmra.mxu0 %v2329_v37  ;;  %v1469_v33 = vld [vmem:[%s2555_s1 + $0x1a8] sm:$0xf0]  ;;  %v1754_v55 = vld [vmem:[%s2555_s1 + $0x204] sm:$0xf]  ;;  %v1795_v9 = vld [vmem:[%s2557_s3 + $0x38] sm:$0xff] }
  0x4e   : > { %977 = vmatpush.bf16.msra.mxu0 %v1448_v28  ;;  %v1533_v28 = vld [vmem:[%s2555_s1 + $0x228] sm:$0xf0]  ;;  %v1738_v0 = vld [vmem:[%s2555_s1 + $0x184] sm:$0xf] }
  0x4f   : > { %970 = vmatpush.bf16.msra.mxu2 %v1328_v38  ;;  %957 = vmatmul.bf16.vlgmr.msrb.gmra.mxu3 %v2124_v59  ;;  %v1613_v59 = vld [vmem:[%s2555_s1 + $0x2c8] sm:$0xf0]  ;;  %v1536_v36 = vor.u32 %v1758_v27, %v1533_v28  ;;  %v1724_v38 = vld [vmem:[%s2555_s1 + $0x114] sm:$0xf]  ;;  %v1788_v14 = vld [vmem:[%s2557_s3] sm:$0xff] }
  0x50   : > { %1005 = vmatpush.bf16.msra.mxu3 %v1576_v32  ;;  %929 = vmatmul.bf16.vlgmr.msrb.gmra.mxu1 %v2340_v44  ;;  %v1616_v18 = vor.u32 %v1778_v11, %v1613_v59  ;;  %v1408_v32 = vor.u32 %v1726_v25, %v1405_v26  ;;  %v1400_v46 = vor.u32 %v1724_v38, %v1397_v39  ;;  %v1581_v5 = vld [vmem:[%s2555_s1 + $0x288] sm:$0xf0] }
  0x51   : > { %991 = vmatpush.bf16.msra.mxu1 %v1512_v41  ;;  %v1525_v41 = vld [vmem:[%s2555_s1 + $0x218] sm:$0xf0]  ;;  %v1789_v59 = vld [vmem:[%s2557_s3 + $0x8] sm:$0xff] }
  0x52   : > { %978 = vmatpush.bf16.msra.mxu0 %v1440_v45  ;;  %971 = vmatmul.bf16.vlgmr.msra.gmra.mxu2 %v2139_v4  ;;  %v1424_v4 = vor.u32 %v1730_v2, %v1421_v3  ;;  %v1740_v45 = vld [vmem:[%s2555_s1 + $0x194] sm:$0xf]  ;;  %v1528_v51 = vor.u32 %v1756_v40, %v1525_v41  ;;  %v1770_v3 = vld [vmem:[%s2555_s1 + $0x284] sm:$0xf]  ;;  %v1071_v41 = vld [vmem:[%s2557_s3 + $0x48] sm:$0x7] }
  0x53   : > { %1019 = vmatpush.bf16.msrb.mxu2 %v1640_v42  ;;  %v1472_v42 = vor.u32 %v1742_v31, %v1469_v33 }
  0x54   : > { %1006 = vmatpush.bf16.msra.mxu3 %v1568_v50  ;;  %v1589_v50 = vld [vmem:[%s2555_s1 + $0x298] sm:$0xf0] }
  0x55   : > { %992 = vmatpush.bf16.msra.mxu1 %v1504_v56  ;;  %v1517_v56 = vld [vmem:[%s2555_s1 + $0x208] sm:$0xf0]  ;;  %v1592_v61 = vor.u32 %v1772_v49, %v1589_v50 }
  0x56   : > { %979 = vmatpush.bf16.msra.mxu0 %v1432_v60  ;;  %v1464_v60 = vor.u32 %v1740_v45, %v1461_v47  ;;  %v1520_v2 = vor.u32 %v1754_v55, %v1517_v56  ;;  %v1796_v56 = vld [vmem:[%s2557_s3 + $0x40] sm:$0xff] }
  0x57   : > { %1020 = vmatpush.bf16.msrb.mxu2 %v1632_v57  ;;  %v1786_v57 = vld [vmem:[%s2555_s1 + $0x304] sm:$0xf] }
  0x58   : > { %1007 = vmatpush.bf16.msra.mxu3 %v1560_v1  ;;  %v1453_v1 = vld [vmem:[%s2555_s1 + $0x188] sm:$0xf0]  ;;  %v1648_v6 = vor.u32 %v1786_v57, %v1645_v58 }
  0x59   : > { %993 = vmatpush.bf16.msra.mxu1 %v1496_v7  ;;  %v1456_v7 = vor.u32 %v1738_v0, %v1453_v1 }
  0x5a   : > { %980 = vmatpush.bf16.msra.mxu0 %v1424_v4  ;;  %v1794_v4 = vld [vmem:[%s2557_s3 + $0x30] sm:$0xff] }
  0x5b   : > { %1021 = vmatpush.bf16.msrb.mxu2 %v1624_v8  ;;  %v1584_v8 = vor.u32 %v1770_v3, %v1581_v5 }
  0x5c   : > { %1008 = vmatpush.bf16.msra.mxu3 %v1552_v12 }
  0x5d   : > { %994 = vmatpush.bf16.msra.mxu1 %v1488_v17 }
  0x5e   : > { %981 = vmatpush.bf16.msra.mxu0 %v1416_v20 }
  0x5f   : > { %1022 = vmatpush.bf16.msrb.mxu2 %v1616_v18 }
  0x60   : > { %1009 = vmatpush.bf16.msra.mxu3 %v1544_v24 }
  0x61   : > { %995 = vmatpush.bf16.msra.mxu1 %v1480_v29 }
  0x62   : > { %982 = vmatpush.bf16.msra.mxu0 %v1408_v32 }
  0x63   : > { %1023 = vmatpush.bf16.msrb.mxu2 %v1608_v30 }
  0x64   : > { %1010 = vmatpush.bf16.msra.mxu3 %v1536_v36 }
  0x65   : > { %996 = vmatpush.bf16.msra.mxu1 %v1472_v42  ;;  %v1113_v42 = vunpack.c.l.b16 %v1071_v41 }
  0x66   : > { %983 = vmatpush.bf16.msra.mxu0 %v1400_v46 }
  0x67   : > { %1024 = vmatpush.bf16.msrb.mxu2 %v1600_v43  ;;  %v1123_v45 = vpack.c.b16 %v1113_v42, %v1113_v42 }
  0x68   : > { %1011 = vmatpush.bf16.msra.mxu3 %v1528_v51 }
  0x69   : > { %997 = vmatpush.bf16.msra.mxu1 %v1464_v60  ;;  %v1139_v50 = vsel %vm1137_vm1, %v1123_v45, 0 }
  0x6a   : > { %984 = vmatpush.bf16.msra.mxu0 %v1392_v62 }
  0x6b   : > { %1025 = vmatpush.bf16.msrb.mxu2 %v1592_v61 }
  0x6c   : > { %1012 = vmatpush.bf16.msra.mxu3 %v1520_v2 }
  0x6d   : > { %998 = vmatpush.bf16.msra.mxu1 %v1456_v7  ;;  %985 = vmatmul.bf16.vlgmr.msra.gmra.mxu0 %v2119_v53  ;;  %v1793_v53 = vld [vmem:[%s2557_s3 + $0x28] sm:$0xff] }
  0x6e   : > { %1040 = vmatpush.bf16.msrb.mxu0 %v1648_v6 }
  0x6f   : > { %1013 = vmatmul.bf16.vlgmr.msra.gmra.mxu3 %v2329_v37  ;;  %1026 = vmatpush.bf16.msrb.mxu2 %v1584_v8  ;;  %v1790_v37 = vld [vmem:[%s2557_s3 + $0x10] sm:$0xff] }
  0x70   : > { %999 = vmatmul.bf16.vlgmr.msra.gmra.mxu1 %v2131_v63  ;;  %v1792_v63 = vld [vmem:[%s2557_s3 + $0x20] sm:$0xff]  ;;  %1161 = vmatpush.bf16.msrb.mxu3 %v1139_v50 }
  0x71   : > { %1141 = vmatpush.bf16.msrb.mxu1 %v1795_v9 }
  0x72   : > { %1027 = vmatmul.bf16.vlgmr.msrb.gmra.mxu2 %v2340_v44  ;;  %v351_v44 = vld [vmem:[%s2556_s2] sm:$0x3] }
  0x73   : > { %v353_v12 = vperm.slane %v351_v44, 0  ;;  %v354_v52 = vperm.slane %v351_v44, 1 }
  0x74   : > { %1162 = vmatpush.bf16.msrb.mxu3 %v1796_v56 }
  0x75   : > { %1142 = vmatpush.bf16.msrb.mxu1 %v1794_v4 }
  0x79   : > { %1143 = vmatpush.bf16.msrb.mxu1 %v1793_v53 }
  0x7d   : > { %1650 = vmatmul.msk.bf16.vlgmr.msrb.gmra.mxu0 %vm847_vm0, %v2231_v48  ;;  %1144 = vmatpush.bf16.msrb.mxu1 %v1792_v63  ;;  %v1791_v48 = vld [vmem:[%s2557_s3 + $0x18] sm:$0xff] }
  0x81   : > { %1145 = vmatpush.bf16.msrb.mxu1 %v1791_v48 }
  0x85   : > { %1146 = vmatpush.bf16.msrb.mxu1 %v1790_v37 }
  0x89   : > { %1147 = vmatpush.bf16.msrb.mxu1 %v1789_v59 }
  0x8d   : > { %1148 = vmatpush.bf16.msrb.mxu1 %v1788_v14 }
  0xaa   : > { %v860_v10 = vpop.f32.mrf.mxu0 }
  0xab   : > { %v861_v15 = vadd.f32 %v860_v10, %v353_v12 }
  0xad   : > { %v874_v13 = vpop.f32.mrf.mxu1 }
  0xae   : > { %v875_v16 = vadd.f32 %v874_v13, %v861_v15 }
  0xb1   : > { %v888_v11 = vpop.f32.mrf.mxu2 }
  0xb2   : > { %v862_v17 = vpop.f32.mrf.mxu0  ;;  %v902_v19 = vpop.f32.mrf.mxu3  ;;  %v889_v22 = vadd.f32 %v888_v11, %v875_v16 }
  0xb3   : > { %v863_v21 = vadd.f32 %v862_v17, %v353_v12  ;;  %v1806_v17 = vld [vmem:[%s2558_s4] ss:$0 sm:$0xff] }
  0xb4   : > { %v903_v24 = vadd.f32 %v902_v19, %v889_v22 }
  0xb5   : > { %v876_v20 = vpop.f32.mrf.mxu1 }
  0xb6   : > { %v877_v23 = vadd.f32 %v876_v20, %v863_v21 }
  0xb9   : > { %v890_v18 = vpop.f32.mrf.mxu2 }
  0xba   : > { %v891_v29 = vadd.f32 %v890_v18, %v877_v23  ;;  %v904_v30 = vpop.f32.mrf.mxu3 }
  0xbc   : > { %v905_v32 = vadd.f32 %v904_v30, %v891_v29 }
  0xc1   : > { %v944_v26 = vpop.f32.mrf.mxu2 }
  0xc9   : > { %v946_v38 = vpop.f32.mrf.mxu2 }
  0xca   : > { %v916_v25 = vpop.f32.mrf.mxu0 }
  0xcb   : > { %v917_v27 = vadd.f32 %v916_v25, %v903_v24 }
  0xcd   : > { %v930_v28 = vpop.f32.mrf.mxu1 }
  0xce   : > { %v931_v31 = vadd.f32 %v930_v28, %v917_v27 }
  0xd0   : > { %v945_v35 = vadd.f32 %v944_v26, %v931_v31 }
  0xd2   : > { %v918_v33 = vpop.f32.mrf.mxu0  ;;  %1807 = vtanh.f32 %v945_v35  ;;  %v958_v43 = vpop.f32.mrf.mxu3 }
  0xd3   : > { %v919_v34 = vadd.f32 %v918_v33, %v905_v32  ;;  %v959_v57 = vadd.f32 %v958_v43, %v354_v52 }
  0xd5   : > { %v932_v36 = vpop.f32.mrf.mxu1  ;;  %v972_v49 = vpop.f32.mrf.mxu2 }
  0xd6   : > { %v933_v39 = vadd.f32 %v932_v36, %v919_v34  ;;  %v973_v61 = vadd.f32 %v972_v49, %v959_v57 }
  0xd8   : > { %v947_v40 = vadd.f32 %v946_v38, %v933_v39  ;;  %v1808_v46 = vpop.eup %1807 }
  0xda   : > { %1809 = vtanh.f32 %v947_v40  ;;  %v960_v54 = vpop.f32.mrf.mxu3 }
  0xdb   : > { %v961_v62 = vadd.f32 %v960_v54, %v354_v52 }
  0xdd   : > { %v974_v58 = vpop.f32.mrf.mxu2 }
  0xde   : > { %v975_v5 = vadd.f32 %v974_v58, %v961_v62 }
  0xe0   : > { %v1810_v47 = vpop.eup %1809 }
  0xe1   : > { %v1051_v51 = vpack.c.bf16 %v1810_v47, %v1808_v46 }
  0xe3   : > { %1149 = vmatmul.bf16.vlgmr.msrb.gmra.mxu1 %v1051_v51 }
  0xea   : > { %v986_v55 = vpop.f32.mrf.mxu0 }
  0xeb   : > { %v987_v2 = vadd.f32 %v986_v55, %v973_v61 }
  0xed   : > { %v1000_v60 = vpop.f32.mrf.mxu1 }
  0xee   : > { %v1001_v7 = vadd.f32 %v1000_v60, %v987_v2 }
  0xf2   : > { %v1014_v0 = vpop.f32.mrf.mxu3  ;;  %v988_v1 = vpop.f32.mrf.mxu0 }
  0xf3   : > { %v989_v6 = vadd.f32 %v988_v1, %v975_v5  ;;  %v1015_v9 = vadd.f32 %v1014_v0, %v1001_v7 }
  0xf5   : > { %v1028_v3 = vpop.f32.mrf.mxu2  ;;  %v1002_v8 = vpop.f32.mrf.mxu1 }
  0xf6   : > { %v1003_v63 = vadd.f32 %v1002_v8, %v989_v6  ;;  %v1029_v37 = vadd.f32 %v1028_v3, %v1015_v9 }
  0xfa   : > { %v1016_v4 = vpop.f32.mrf.mxu3  ;;  %v1042_v53 = vpop.f32.mrf.mxu0 }
  0xfb   : > { %v1017_v48 = vadd.f32 %v1016_v4, %v1003_v63  ;;  %v1043_v10 = vadd.f32 %v1042_v53, %v1029_v37 }
  0xfd   : > { %v1030_v44 = vpop.f32.mrf.mxu2  ;;  %1811 = vtanh.f32 %v1043_v10 }
  0xfe   : > { %v1031_v11 = vadd.f32 %v1030_v44, %v1017_v48 }
 0x102   : > { %v1044_v59 = vpop.f32.mrf.mxu0 }
 0x103   : > { %v1045_v12 = vadd.f32 %v1044_v59, %v1031_v11  ;;  %v1812_v13 = vpop.eup %1811 }
 0x105   : > { %1813 = vtanh.f32 %v1045_v12 }
 0x10b   : > { %v1814_v14 = vpop.eup %1813 }
 0x10c   : > { %v1052_v15 = vpack.c.bf16 %v1814_v14, %v1812_v13 }
 0x10e   : > { %1687 = vmatmul.msk.bf16.vlgmr.msrb.gmra.mxu3 %vm1133_vm2, %v1052_v15 }
 0x160   : > { %v1150_v16 = vpop.f32.mrf.mxu1 }
 0x161   : > { %v1151_v18 = vadd.f32 %v1806_v17, %v1150_v16 }
 0x168   : > { %v1152_v21 = vpop.f32.mrf.mxu1 }
 0x169   : > { %v1153_v22 = vadd.f32 %v1806_v17, %v1152_v21 }
 0x191   : > { %v1164_v19 = vpop.f32.mrf.mxu3 }
 0x192   : > { %v1165_v20 = vadd.f32 %v1164_v19, %v1151_v18 }
 0x194   : > { %1169 = vmax.xlane.f32.xlu0 %v1165_v20 }
 0x199   : > { %v1166_v23 = vpop.f32.mrf.mxu3 }
 0x19a   : > { %v1167_v24 = vadd.f32 %v1166_v23, %v1153_v22 }
 0x19c   : > { %1171 = vmax.xlane.f32.xlu0 %v1167_v24 }
 0x207   : > { %v1170_v25 = vpop.xlane.xlu0 %1169 }
 0x208   : > { %v1173_v26 = vsub.f32 %v1165_v20, %v1170_v25 }
 0x20a   : > { %v1175_v27 = vmul.f32 1.442695, %v1173_v26 }
 0x20c   : > { %1815 = vpow2.f32 %v1175_v27 }
 0x20f   : > { %v1172_v28 = vpop.xlane.xlu0 %1171 }
 0x210   : > { %v1174_v29 = vsub.f32 %v1167_v24, %v1172_v28 }
 0x212   : > { %v1816_v30 = vpop.eup %1815  ;;  %v1177_v31 = vmul.f32 1.442695, %v1174_v29 }
 0x213   : > { %1179 = vadd.xlane.f32.xlu1 %v1816_v30 }
 0x214   : > { %1817 = vpow2.f32 %v1177_v31 }
 0x21a   : > { %v1818_v32 = vpop.eup %1817 }
 0x21b   : > { %1181 = vadd.xlane.f32.xlu1 %v1818_v32 }
 0x286   : > { %v1180_v33 = vpop.xlane.xlu1 %1179 }
 0x287   : > { %1819 = vlog2.f32 %v1180_v33 }
 0x28d   : > { %v1820_v34 = vpop.eup %1819 }
 0x28e   : > { %v1184_v35 = vmul.f32 0.6931472, %v1820_v34  ;;  %v1182_v36 = vpop.xlane.xlu1 %1181 }
 0x28f   : > { %1821 = vlog2.f32 %v1182_v36 }
 0x290   : > { %v1187_v38 = vsub.f32 %v1173_v26, %v1184_v35 }
 0x292   : > { %1190 = vst.msk [vmem:[%s229_s9] sm:$0xff] %vm1189_vm3, %v1187_v38 }
 0x295   : > { %v1822_v39 = vpop.eup %1821 }
 0x296   : > { %v1186_v40 = vmul.f32 0.6931472, %v1822_v39 }
 0x298   : > { %v1188_v41 = vsub.f32 %v1174_v29, %v1186_v40 }
 0x29a   : > { %1191 = vst.msk [vmem:[%s229_s9 + $0x8] sm:$0xff] %vm1189_vm3, %v1188_v41 }
 0x29b PF: > { %s15_s18 = sadd.s32 1, %s1829_s18  }
 0x29c   : > { %p12_p4 = scmp.ge.s32.totalorder %s15_s18, 4  }
 0x29e   :  { %14 = sbr.rel (!%p12_p4) target bundleno = 1 (0x1), region = 70 }

</bundles_post_ra>
